<compile_context>
chip_gen: v6e
topology: v6e:2x2x1
jax: 0.10.0
libtpu: 0.0.40
codegen_flags: <defaults>
</compile_context>

<pallas_src>
import numpy as np
import jax
import jax.numpy as jnp
from jax.experimental import pallas as pl
from jax.experimental.pallas import tpu as pltpu


# ----------------------------------------------------------------------------
# Helpers
# ----------------------------------------------------------------------------
def _cdiv(a: int, b: int) -> int:
    return -(-a // b)


def _round_down(x: int, m: int) -> int:
    return (x // m) * m


# ----------------------------------------------------------------------------
# Kernel (SSE sweep + KL fold-in at finalize)
# ----------------------------------------------------------------------------
def _make_sse_kld_kernel(block_rows: int, rows: int, kper: int, batch: int,
                         needs_mask: bool):
    """kernel(r_ref, x_ref, mu_ref, lv_ref, sse_ref, kld_ref, acc_ref)."""

    def kernel(r_ref, x_ref, mu_ref, lv_ref, sse_ref, kld_ref, acc_ref):
        p = pl.program_id(0)
        k = pl.program_id(1)

        @pl.when(k == 0)
        def _init():
            acc_ref[...] = jnp.zeros_like(acc_ref)

        # Hot path: elementwise only (VPU); cast from native dtype happens here.
        d = r_ref[...].astype(jnp.float32) - x_ref[...].astype(jnp.float32)
        d2 = d * d
        if needs_mask:
            # Masked tail: zero out rows past the true row count (also covers a
            # fully-out-of-range duplicated block produced by the clamped
            # index_map when the block count is odd).
            blk = p * kper + k
            row_start = blk * block_rows
            row_ids = row_start + jax.lax.broadcasted_iota(
                jnp.int32, (block_rows, 128), 0)
            d2 = jnp.where(row_ids < rows, d2, 0.0)

        # Fold the block into a single (8,128) vreg accumulator: pure VALU adds
        # (no XLU, no full-block accumulator store).
        acc_ref[...] += jnp.sum(d2.reshape(block_rows // 8, 8, 128), axis=0)

        @pl.when(k == pl.num_programs(1) - 1)
        def _finalize():
            sse_ref[...] = acc_ref[...].reshape(sse_ref.shape)
            # KL term (tiny, resident blocks): mean over batch of
            # -0.5 * sum(1 + log_var - mu^2 - exp(log_var), dim=1)
            #   == sum(-0.5 * (...)) / batch
            mu = mu_ref[...].astype(jnp.float32)
            lv = lv_ref[...].astype(jnp.float32)
            kl = jnp.sum(-0.5 * (1.0 + lv - mu * mu - jnp.exp(lv))) / batch
            kld_ref[...] = jnp.broadcast_to(kl, kld_ref.shape)

    return kernel


# ----------------------------------------------------------------------------
# Wrapper
# ----------------------------------------------------------------------------
def vae_loss(out: dict, M_N: float, *, target_block_bytes: int = 8 * 1024 * 1024):
    recons = out["reconstruct"]
    inputs = out["input"]
    mu = out["mu"]
    log_var = out["log_var"]

    if inputs.dtype != recons.dtype:
        inputs = inputs.astype(recons.dtype)

    n_elem = int(np.prod(recons.shape))
    itemsize = int(np.dtype(recons.dtype).itemsize)
    # dtype-aware sublane packing: f32 -> 8, bf16 -> 16, int8/fp8 -> 32
    sub = max(8, 32 // itemsize)
    B, L = mu.shape
    lanes = 128

    tail = n_elem % lanes
    main = n_elem - tail
    rows = main // lanes

    # Tiny-input fallback: less than one row-group is not worth a kernel launch.
    if rows < sub:
        r32 = recons.astype(jnp.float32)
        x32 = inputs.astype(jnp.float32)
        rec = jnp.mean((r32 - x32) ** 2)
        mu32 = mu.astype(jnp.float32)
        lv32 = log_var.astype(jnp.float32)
        kld = jnp.float32(M_N) * jnp.mean(
            -0.5 * jnp.sum(1.0 + lv32 - mu32 * mu32 - jnp.exp(lv32), axis=1))
        return {"loss": rec + kld, "Reconstruction_Loss": rec, "KLD": kld}

    # --- lane-dense (rows, 128) view of the bulk; no full-array padding ---
    r_flat = recons.reshape(-1)
    x_flat = inputs.reshape(-1)
    if tail:
        r2 = jax.lax.slice(r_flat, (0,), (main,)).reshape(rows, lanes)
        x2 = jax.lax.slice(x_flat, (0,), (main,)).reshape(rows, lanes)
    else:
        # Contiguous row-major reshape: metadata only, no relayout copy.
        r2 = r_flat.reshape(rows, lanes)
        x2 = x_flat.reshape(rows, lanes)

    # --- row tiling: big blocks, cdiv grid, masked last block ---
    tb = min(int(target_block_bytes), 10 * 1024 * 1024)  # keep 4x block <= ~44 MiB
    cap_rows = max(sub, _round_down(tb // (lanes * itemsize), sub))
    block_rows = min(cap_rows, _round_down(rows, sub))
    num_blocks = _cdiv(rows, block_rows)

    # Unconditional 2-way TensorCore split whenever there is >1 block
    # (v7x megacore; harmless serial outer loop on v5e/v6e).
    num_cores = 2 if num_blocks >= 2 else 1
    kper = _cdiv(num_blocks, num_cores)
    needs_mask = (rows % block_rows != 0) or (num_cores * kper != num_blocks)

    def in_idx(p, k):
        # Clamp so an overflow slot (odd block count split 2 ways) re-reads the
        # last valid block; its contribution is zeroed by the in-kernel mask.
        blk = jnp.minimum(p * kper + k, num_blocks - 1)
        return (blk, 0)

    kernel = _make_sse_kld_kernel(block_rows, rows, kper, B, needs_mask)

    # --- VMEM budget from actual footprint, capped for v7x (64 MiB physical) ---
    block_bytes = block_rows * lanes * itemsize
    vmem_need = (
        2 * 2 * block_bytes                      # 2 inputs, double-buffered
        + 2 * B * L * 4 * 2                      # mu/log_var resident (+slack)
        + 8 * 128 * 4                            # (8,128) f32 accumulator
        + 2 * 2 * 8 * 128 * 4                    # two small outputs
        + 2 * 1024 * 1024                        # headroom
    )
    vmem_limit = int(min(max(vmem_need, 4 * 1024 * 1024), 48 * 1024 * 1024))

    sse_parts, kld_parts = pl.pallas_call(
        kernel,
        out_shape=(
            jax.ShapeDtypeStruct((num_cores, 8, 128), jnp.float32),
            jax.ShapeDtypeStruct((num_cores, 8, 128), jnp.float32),
        ),
        grid_spec=pltpu.PrefetchScalarGridSpec(
            num_scalar_prefetch=0,
            grid=(num_cores, kper),
            in_specs=[
                pl.BlockSpec((block_rows, lanes), in_idx),        # reconstruct tile
                pl.BlockSpec((block_rows, lanes), in_idx),        # input tile
                pl.BlockSpec((B, L), lambda p, k: (0, 0)),        # mu (resident)
                pl.BlockSpec((B, L), lambda p, k: (0, 0)),        # log_var (resident)
            ],
            out_specs=[
                pl.BlockSpec((1, 8, 128), lambda p, k: (p, 0, 0)),  # SSE partial
                pl.BlockSpec((1, 8, 128), lambda p, k: (p, 0, 0)),  # raw KLD
            ],
            scratch_shapes=[pltpu.VMEM((8, 128), jnp.float32)],
        ),
        compiler_params=pltpu.CompilerParams(
            dimension_semantics=("parallel", "arbitrary"),
            vmem_limit_bytes=vmem_limit,
        ),
    )(r2, x2, mu, log_var)

    sse = jnp.sum(sse_parts)
    if tail:
        # Ragged tail (< 128 elements): trivial jnp sum, negligible.
        r_t = jax.lax.slice(r_flat, (main,), (n_elem,)).astype(jnp.float32)
        x_t = jax.lax.slice(x_flat, (main,), (n_elem,)).astype(jnp.float32)
        sse = sse + jnp.sum((r_t - x_t) ** 2)

    rec = sse / jnp.float32(n_elem)                # F.mse_loss default: mean over all
    kld = jnp.float32(M_N) * kld_parts[0, 0, 0]
    loss = rec + kld
    return {"loss": loss, "Reconstruction_Loss": rec, "KLD": kld}


# ----------------------------------------------------------------------------
# Reference + self-test
# ----------------------------------------------------------------------------
def _reference(out, M_N):
    recons = out["reconstruct"].astype(jnp.float32)
    inputs = out["input"].astype(jnp.float32)
    mu = out["mu"].astype(jnp.float32)
    lv = out["log_var"].astype(jnp.float32)
    rec = jnp.mean((recons - inputs) ** 2)
    kld = M_N * jnp.mean(-0.5 * jnp.sum(1.0 + lv - mu ** 2 - jnp.exp(lv), axis=1), axis=0)
    return {"loss": rec + kld, "Reconstruction_Loss": rec, "KLD": kld}


def _check(result, ref):
    for name in ("loss", "Reconstruction_Loss", "KLD"):
        np.testing.assert_allclose(
            np.asarray(result[name]), np.asarray(ref[name]), rtol=1e-5, atol=1e-6)


def _make_inputs(key, shape, latent, dtype):
    k1, k2, k3, k4 = jax.random.split(key, 4)
    B = shape[0]
    return {
        "reconstruct": jax.random.normal(k1, shape, dtype=jnp.float32).astype(dtype),
        "input": jax.random.normal(k2, shape, dtype=jnp.float32).astype(dtype),
        "mu": jax.random.normal(k3, (B, latent), dtype=jnp.float32),
        "log_var": 0.1 * jax.random.normal(k4, (B, latent), dtype=jnp.float32),
    }


if __name__ == "__main__":
    key = jax.random.PRNGKey(0)
    keys = jax.random.split(key, 5)
    M_N = 0.005

    # 1) f32, single large block, single-core grid path.
    out1 = _make_inputs(keys[0], (8, 4, 16, 16), 32, jnp.float32)
    res = vae_loss(out1, M_N)
    jax.block_until_ready(res["loss"])
    _check(res, _reference(out1, M_N))

    # 2) Same inputs, tiny tiles -> multi-block accumulation + 2-core split.
    res = vae_loss(out1, M_N, target_block_bytes=8 * 1024)
    jax.block_until_ready(res["loss"])
    _check(res, _reference(out1, M_N))

    # 3) Odd block count -> clamped index_map + masked partial last block.
    out3 = _make_inputs(keys[1], (5, 4, 16, 16), 32, jnp.float32)
    res = vae_loss(out3, M_N, target_block_bytes=16 * 128 * 4)
    jax.block_until_ready(res["loss"])
    _check(res, _reference(out3, M_N))

    # 4) bf16 inputs -> dtype-aware 16-row granularity, in-kernel f32 cast.
    out4 = _make_inputs(keys[2], (4, 4, 16, 16), 32, jnp.bfloat16)
    res = vae_loss(out4, M_N)
    jax.block_until_ready(res["loss"])
    _check(res, _reference(out4, M_N))

    # 5) Element count not a multiple of 128 -> ragged tail handled in jnp.
    out5 = _make_inputs(keys[3], (3, 5, 11, 13), 16, jnp.float32)
    res = vae_loss(out5, M_N)
    jax.block_until_ready(res["loss"])
    _check(res, _reference(out5, M_N))

    print("KERNEL_OK")
</pallas_src>

<mosaic_0001>
module attributes {stable_mosaic.version = 11 : i64} {
  func.func @kernel(%arg0: i32, %arg1: i32, %arg2: memref<64x128xf32, #tpu.memory_space<vmem>>, %arg3: memref<64x128xf32, #tpu.memory_space<vmem>>, %arg4: memref<8x32xf32, #tpu.memory_space<vmem>>, %arg5: memref<8x32xf32, #tpu.memory_space<vmem>>, %arg6: memref<1x8x128xf32, #tpu.memory_space<vmem>>, %arg7: memref<1x8x128xf32, #tpu.memory_space<vmem>>, %arg8: memref<8x128xf32, #tpu.memory_space<vmem>>) attributes {dimension_semantics = [#tpu.dimension_semantics<parallel>, #tpu.dimension_semantics<arbitrary>], iteration_bounds = array<i64: 1, 1>, scalar_prefetch = 0 : i64, scratch_operands = 1 : i64, tpu.core_type = #tpu.core_type<tc>, window_params = [{transform_indices = @transform_0, window_bounds = array<i64: 64, 128>}, {transform_indices = @transform_1, window_bounds = array<i64: 64, 128>}, {pipeline_mode = #tpu.pipeline_mode<synchronous>, transform_indices = @transform_2, window_bounds = array<i64: 8, 32>}, {pipeline_mode = #tpu.pipeline_mode<synchronous>, transform_indices = @transform_3, window_bounds = array<i64: 8, 32>}, {transform_indices = @transform_4, window_bounds = array<i64: 1, 8, 128>}, {transform_indices = @transform_5, window_bounds = array<i64: 1, 8, 128>}]} {
    %c0_i32 = arith.constant 0 : i32
    %0 = arith.cmpi eq, %arg1, %c0_i32 : i32
    %1 = arith.extui %0 : i1 to i32
    %c0_i32_0 = arith.constant 0 : i32
    %2 = arith.cmpi ne, %1, %c0_i32_0 : i32
    scf.if %2 {
      %cst_10 = arith.constant 0.000000e+00 : f32
      %15 = vector.broadcast %cst_10 : f32 to vector<8x128xf32>
      %c0_11 = arith.constant 0 : index
      %c0_12 = arith.constant 0 : index
      %16 = vector.load %arg8[%c0_11, %c0_12] : memref<8x128xf32, #tpu.memory_space<vmem>>, vector<8x128xf32>
      tpu.vector_store %arg8[%c0_11, %c0_12], %15 {strides = array<i32>} : memref<8x128xf32, #tpu.memory_space<vmem>>, vector<8x128xf32>,
    } else {
    }
    %c0 = arith.constant 0 : index
    %c0_1 = arith.constant 0 : index
    %3 = vector.load %arg2[%c0, %c0_1] : memref<64x128xf32, #tpu.memory_space<vmem>>, vector<64x128xf32>
    %c0_2 = arith.constant 0 : index
    %c0_3 = arith.constant 0 : index
    %4 = vector.load %arg3[%c0_2, %c0_3] : memref<64x128xf32, #tpu.memory_space<vmem>>, vector<64x128xf32>
    %5 = arith.subf %3, %4 : vector<64x128xf32>
    %6 = arith.mulf %5, %5 : vector<64x128xf32>
    %c0_4 = arith.constant 0 : index
    %c0_5 = arith.constant 0 : index
    %7 = vector.load %arg8[%c0_4, %c0_5] : memref<8x128xf32, #tpu.memory_space<vmem>>, vector<8x128xf32>
    %8 = vector.shape_cast %6 : vector<64x128xf32> to vector<8x8x128xf32>
    %cst = arith.constant dense<0.000000e+00> : vector<8x128xf32>
    %9 = vector.multi_reduction <add>, %8, %cst [0] : vector<8x8x128xf32> to vector<8x128xf32>
    %10 = arith.addf %7, %9 : vector<8x128xf32>
    %c0_6 = arith.constant 0 : index
    %c0_7 = arith.constant 0 : index
    %11 = vector.load %arg8[%c0_6, %c0_7] : memref<8x128xf32, #tpu.memory_space<vmem>>, vector<8x128xf32>
    tpu.vector_store %arg8[%c0_6, %c0_7], %10 {strides = array<i32>} : memref<8x128xf32, #tpu.memory_space<vmem>>, vector<8x128xf32>,
    %c0_i32_8 = arith.constant 0 : i32
    %12 = arith.cmpi eq, %arg1, %c0_i32_8 : i32
    %13 = arith.extui %12 : i1 to i32
    %c0_i32_9 = arith.constant 0 : i32
    %14 = arith.cmpi ne, %13, %c0_i32_9 : i32
    scf.if %14 {
      %c0_10 = arith.constant 0 : index
      %c0_11 = arith.constant 0 : index
      %15 = vector.load %arg8[%c0_10, %c0_11] : memref<8x128xf32, #tpu.memory_space<vmem>>, vector<8x128xf32>
      %16 = vector.shape_cast %15 : vector<8x128xf32> to vector<1x8x128xf32>
      %c0_12 = arith.constant 0 : index
      %c0_13 = arith.constant 0 : index
      %c0_14 = arith.constant 0 : index
      %17 = vector.load %arg6[%c0_12, %c0_13, %c0_14] : memref<1x8x128xf32, #tpu.memory_space<vmem>>, vector<1x8x128xf32>
      tpu.vector_store %arg6[%c0_12, %c0_13, %c0_14], %16 {strides = array<i32>} : memref<1x8x128xf32, #tpu.memory_space<vmem>>, vector<1x8x128xf32>,
      %c0_15 = arith.constant 0 : index
      %c0_16 = arith.constant 0 : index
      %18 = vector.load %arg4[%c0_15, %c0_16] : memref<8x32xf32, #tpu.memory_space<vmem>>, vector<8x32xf32>
      %c0_17 = arith.constant 0 : index
      %c0_18 = arith.constant 0 : index
      %19 = vector.load %arg5[%c0_17, %c0_18] : memref<8x32xf32, #tpu.memory_space<vmem>>, vector<8x32xf32>
      %cst_19 = arith.constant 1.000000e+00 : f32
      %20 = vector.broadcast %cst_19 : f32 to vector<8x32xf32>
      %21 = arith.addf %20, %19 : vector<8x32xf32>
      %22 = arith.mulf %18, %18 : vector<8x32xf32>
      %23 = arith.subf %21, %22 : vector<8x32xf32>
      %24 = math.exp %19 : vector<8x32xf32>
      %25 = arith.subf %23, %24 : vector<8x32xf32>
      %cst_20 = arith.constant -5.000000e-01 : f32
      %26 = vector.broadcast %cst_20 : f32 to vector<8x32xf32>
      %27 = arith.mulf %26, %25 : vector<8x32xf32>
      %28 = vector.shape_cast %27 : vector<8x32xf32> to vector<1x8x32xf32>
      %cst_21 = arith.constant dense<0.000000e+00> : vector<1xf32>
      %29 = vector.multi_reduction <add>, %28, %cst_21 [1, 2] : vector<1x8x32xf32> to vector<1xf32>
      %30 = vector.shape_cast %29 : vector<1xf32> to vector<1x1x1xf32>
      %31 = vector.extract %30[0, 0, 0] : f32 from vector<1x1x1xf32>
      %cst_22 = arith.constant 8.000000e+00 : f32
      %32 = arith.divf %31, %cst_22 : f32
      %33 = vector.broadcast %32 : f32 to vector<1x8x128xf32>
      %c0_23 = arith.constant 0 : index
      %c0_24 = arith.constant 0 : index
      %c0_25 = arith.constant 0 : index
      %34 = vector.load %arg7[%c0_23, %c0_24, %c0_25] : memref<1x8x128xf32, #tpu.memory_space<vmem>>, vector<1x8x128xf32>
      tpu.vector_store %arg7[%c0_23, %c0_24, %c0_25], %33 {strides = array<i32>} : memref<1x8x128xf32, #tpu.memory_space<vmem>>, vector<1x8x128xf32>,
    } else {
    }
    return
  }
  func.func @transform_0(%arg0: i32, %arg1: i32) -> (i32, i32) {
    %c1_i32 = arith.constant 1 : i32
    %0 = arith.muli %arg0, %c1_i32 : i32
    %1 = arith.addi %0, %arg1 : i32
    %c0_i32 = arith.constant 0 : i32
    %2 = arith.minsi %1, %c0_i32 : i32
    %c0_i32_0 = arith.constant 0 : i32
    %c0_i32_1 = arith.constant 0 : i32
    return %2, %c0_i32_0 : i32, i32
  }
  func.func @transform_1(%arg0: i32, %arg1: i32) -> (i32, i32) {
    %c1_i32 = arith.constant 1 : i32
    %0 = arith.muli %arg0, %c1_i32 : i32
    %1 = arith.addi %0, %arg1 : i32
    %c0_i32 = arith.constant 0 : i32
    %2 = arith.minsi %1, %c0_i32 : i32
    %c0_i32_0 = arith.constant 0 : i32
    %c0_i32_1 = arith.constant 0 : i32
    return %2, %c0_i32_0 : i32, i32
  }
  func.func @transform_2(%arg0: i32, %arg1: i32) -> (i32, i32) {
    %c0_i32 = arith.constant 0 : i32
    %c0_i32_0 = arith.constant 0 : i32
    %c0_i32_1 = arith.constant 0 : i32
    return %c0_i32, %c0_i32_0 : i32, i32
  }
  func.func @transform_3(%arg0: i32, %arg1: i32) -> (i32, i32) {
    %c0_i32 = arith.constant 0 : i32
    %c0_i32_0 = arith.constant 0 : i32
    %c0_i32_1 = arith.constant 0 : i32
    return %c0_i32, %c0_i32_0 : i32, i32
  }
  func.func @transform_4(%arg0: i32, %arg1: i32) -> (i32, i32, i32) {
    %c0_i32 = arith.constant 0 : i32
    %c0_i32_0 = arith.constant 0 : i32
    %c0_i32_1 = arith.constant 0 : i32
    return %arg0, %c0_i32, %c0_i32_0 : i32, i32, i32
  }
  func.func @transform_5(%arg0: i32, %arg1: i32) -> (i32, i32, i32) {
    %c0_i32 = arith.constant 0 : i32
    %c0_i32_0 = arith.constant 0 : i32
    %c0_i32_1 = arith.constant 0 : i32
    return %arg0, %c0_i32, %c0_i32_0 : i32, i32, i32
  }
}

</mosaic_0001>

<bundles_post_ra>
// kernel: tpu_custom_call.1
= control target key start
LH: loop header
LB: loop body
LE: loop exit
PB: predicated region body
PF: predicated region fallthrough
CT: control target
= control target key end

     0   :  { %11 = vsyncpa [#allocation4], 0  ;;  %s402_s0 = inlined_call_operand.hbm [shape: f32[64,128], index: 0, kind: input, shape index: {}]   ;;  %s403_s1 = inlined_call_operand.hbm [shape: f32[64,128], index: 1, kind: input, shape index: {}]   ;;  %s404_s2 = inlined_call_operand.hbm [shape: f32[8,32], index: 2, kind: input, shape index: {}]   ;;  %s405_s3 = inlined_call_operand.hbm [shape: f32[8,32], index: 3, kind: input, shape index: {}]   ;;  %s406_s4 = inlined_call_operand.hbm [shape: f32[1,8,128], index: 4, kind: output, shape index: {0}]   ;;  %s407_s5 = inlined_call_operand.hbm [shape: f32[1,8,128], index: 5, kind: output, shape index: {1}]  }
   0x1   :  { %12 = vsyncpa [#allocation7], 0 }
   0x2   :  { %13 = vsyncpa [#allocation10], 0 }
   0x3   :  { %14 = vsyncpa [#allocation5], 0 }
   0x4   :  { %15 = vsyncpa [#allocation13], 0  ;;  %s346_s18 = smov [#allocation6]   ;;  %s347_s20 = smov [#allocation3]  }
   0x5   :  { %s45_s19 = sshll.u32 %s346_s18, 4  ;;  %s27_s21 = sshll.u32 %s347_s20, 4  ;;  %s46_s19 = int_to_ptr.vmem [resolvable:$true] %s45_s19  ;;  %s28_s21 = int_to_ptr.vmem [resolvable:$true] %s27_s21 }
   0x6   :  { %s224_s22 = scalar_lea.vmem %s46_s19, 1024  ;;  %p229_p1 = scmp.lt.s32.totalorder %s46_s19, %s46_s19 }
   0x7   :  { %p225_p0 = scmp.ne.s32.totalorder %s46_s19, %s224_s22  ;;  %p230_p2 = scmp.lt.s32.totalorder %s224_s22, %s224_s22 }
   0x9   :  { %p231_p3 = por %p230_p2, %p229_p1 }
   0xb   :  { %p232_p4 = pnand %p231_p3, %p225_p0 }
   0xd   :  { %235 = shalt.err (!%p232_p4)
}
   0xe   :  { %s348_s23 = smov 128   ;;  %s349_s24 = smov 8  }
   0xf   :  { %51 = dma.hbm_to_vmem [thread:$0]  %s403_s1, 1024, %s46_s19, [#allocation7], %s348_s23, %s348_s23, %s349_s24  }
  0x10   :  { %s244_s27 = scalar_lea.vmem %s28_s21, 1024  ;;  %p249_p6 = scmp.lt.s32.totalorder %s28_s21, %s28_s21 }
  0x11   :  { %p245_p5 = scmp.ne.s32.totalorder %s28_s21, %s244_s27  ;;  %p250_p7 = scmp.lt.s32.totalorder %s244_s27, %s244_s27 }
  0x13   :  { %p251_p8 = por %p250_p7, %p249_p6 }
  0x15   :  { %p252_p9 = pnand %p251_p8, %p245_p5 }
  0x17   :  { %255 = shalt.err (!%p252_p9)
}
  0x18   :  { %33 = dma.hbm_to_vmem [thread:$0]  %s402_s0, 1024, %s28_s21, [#allocation4], %s348_s23, %s348_s23, %s349_s24  }
  0x19   :  { %s350_s30 = smov [#allocation8]   ;;  %s351_s7 = smov [#allocation9]  }
  0x1a   :  { %s58_s6 = sshll.u32 %s350_s30, 4  ;;  %s68_s8 = sshll.u32 %s351_s7, 4  ;;  %s59_s6 = int_to_ptr.vmem [resolvable:$true] %s58_s6  ;;  %s69_s8 = int_to_ptr.vmem [resolvable:$true] %s68_s8 }
  0x1b   :  { %s264_s9 = scalar_lea.vmem %s59_s6, 128  ;;  %p269_p11 = scmp.lt.s32.totalorder %s59_s6, %s59_s6 }
  0x1c   :  { %p265_p10 = scmp.ne.s32.totalorder %s59_s6, %s264_s9  ;;  %p270_p12 = scmp.lt.s32.totalorder %s264_s9, %s264_s9 }
  0x1e   :  { %p271_p13 = por %p270_p12, %p269_p11 }
  0x20   :  { %p272_p0 = pnand %p271_p13, %p265_p10 }
  0x22   :  { %275 = shalt.err (!%p272_p0)
}
  0x23   :  { %61 = dma.hbm_to_vmem [thread:$0]  %s404_s2, 128, %s59_s6, [#allocation7]  }
  0x24   :  { %s284_s11 = scalar_lea.vmem %s69_s8, 128  ;;  %p289_p2 = scmp.lt.s32.totalorder %s69_s8, %s69_s8 }
  0x25   :  { %p285_p1 = scmp.ne.s32.totalorder %s69_s8, %s284_s11  ;;  %p290_p3 = scmp.lt.s32.totalorder %s284_s11, %s284_s11 }
  0x27   :  { %p291_p4 = por %p290_p3, %p289_p2 }
  0x29   :  { %p292_p5 = pnand %p291_p4, %p285_p1 }
  0x2b   :  { %295 = shalt.err (!%p292_p5)
}
  0x2c   :  { %71 = dma.hbm_to_vmem [thread:$0]  %s405_s3, 128, %s69_s8, [#allocation10]  }
  0x2d   :  { %336 = dma.done.wait [#allocation4], 1024  }
  0x2e   :  { %337 = vsyncadd [#allocation4], 4294966272 }
  0x2f   :  { %338 = dma.done.wait [#allocation7], 1152  }
  0x30   :  { %339 = vsyncadd [#allocation7], 4294966144 }
  0x31   :  { %340 = dma.done.wait [#allocation10], 128  }
  0x32   :  { %341 = vsyncadd [#allocation10], 4294967168  ;;  %v145_v0 = vld [vmem:[#allocation9] sm:$0xff]  ;;  %v144_v2 = vld [vmem:[#allocation8] sm:$0xff]  ;;  %vm153_vm0 = vcmask 261120   ;;  %s352_s2 = smov [#allocation11]  }
  0x33   :  { %v149_v1 = vmul.f32 1.442695, %v145_v0  ;;  %v146_v3 = vadd.f32 1.0, %v145_v0  ;;  %v147_v4 = vmul.f32 %v144_v2, %v144_v2  ;;  %v97_v10 = vld [vmem:[#allocation3] sm:$0xff]  ;;  %v98_v11 = vld [vmem:[#allocation3 + $0x8] sm:$0xff]  ;;  %v99_v15 = vld [vmem:[#allocation3 + $0x10] sm:$0xff] }
  0x34   :  { %v105_v12 = vld [vmem:[#allocation6] sm:$0xff]  ;;  %v106_v13 = vld [vmem:[#allocation6 + $0x8] sm:$0xff]  ;;  %v107_v16 = vld [vmem:[#allocation6 + $0x10] sm:$0xff]  ;;  %s175_s3 = sshll.u32 %s352_s2, 4  ;;  %s176_s3 = int_to_ptr.vmem [resolvable:$true] %s175_s3 }
  0x35   :  { %214 = vpow2.f32 %v149_v1  ;;  %v148_v5 = vsub.f32 %v146_v3, %v147_v4  ;;  %v113_v14 = vsub.f32 %v97_v10, %v105_v12  ;;  %v114_v17 = vsub.f32 %v98_v11, %v106_v13  ;;  %v100_v20 = vld [vmem:[#allocation3 + $0x18] sm:$0xff]  ;;  %v101_v25 = vld [vmem:[#allocation3 + $0x20] sm:$0xff]  ;;  %v102_v30 = vld [vmem:[#allocation3 + $0x28] sm:$0xff]  ;;  %s296_s13 = scalar_lea.vmem %s176_s3, 128  ;;  %p301_p7 = scmp.lt.s32.totalorder %s176_s3, %s176_s3 }
  0x36   :  { %v115_v18 = vsub.f32 %v99_v15, %v107_v16  ;;  %v108_v21 = vld [vmem:[#allocation6 + $0x18] sm:$0xff]  ;;  %v109_v26 = vld [vmem:[#allocation6 + $0x20] sm:$0xff]  ;;  %v110_v31 = vld [vmem:[#allocation6 + $0x28] sm:$0xff]  ;;  %p297_p6 = scmp.ne.s32.totalorder %s176_s3, %s296_s13  ;;  %p302_p8 = scmp.lt.s32.totalorder %s296_s13, %s296_s13 }
  0x37   :  { %v121_v19 = vmul.f32 %v113_v14, %v113_v14  ;;  %v122_v22 = vmul.f32 %v114_v17, %v114_v17  ;;  %v116_v23 = vsub.f32 %v100_v20, %v108_v21  ;;  %v117_v28 = vsub.f32 %v101_v25, %v109_v26  ;;  %v103_v35 = vld [vmem:[#allocation3 + $0x30] sm:$0xff]  ;;  %v104_v40 = vld [vmem:[#allocation3 + $0x38] sm:$0xff] }
  0x38   :  { %v123_v24 = vmul.f32 %v115_v18, %v115_v18  ;;  %v118_v33 = vsub.f32 %v102_v30, %v110_v31  ;;  %v111_v36 = vld [vmem:[#allocation6 + $0x30] sm:$0xff]  ;;  %v112_v41 = vld [vmem:[#allocation6 + $0x38] sm:$0xff]  ;;  %p303_p9 = por %p302_p8, %p301_p7 }
  0x39   :  { %v130_v27 = vadd.f32 %v122_v22, %v121_v19  ;;  %v124_v29 = vmul.f32 %v116_v23, %v116_v23  ;;  %v125_v34 = vmul.f32 %v117_v28, %v117_v28  ;;  %v119_v38 = vsub.f32 %v103_v35, %v111_v36 }
  0x3a   :  { %v126_v39 = vmul.f32 %v118_v33, %v118_v33  ;;  %v120_v43 = vsub.f32 %v104_v40, %v112_v41  ;;  %p304_p10 = pnand %p303_p9, %p297_p6 }
  0x3b   :  { %v131_v32 = vadd.f32 %v130_v27, %v123_v24  ;;  %v127_v44 = vmul.f32 %v119_v38, %v119_v38 }
  0x3c   :  { %v128_v46 = vmul.f32 %v120_v43, %v120_v43 }
  0x3d   :  { %v132_v37 = vadd.f32 %v131_v32, %v124_v29 }
  0x3f   :  { %v133_v42 = vadd.f32 %v132_v37, %v125_v34 }
  0x41   :  { %v134_v45 = vadd.f32 %v133_v42, %v126_v39 }
  0x42   :  { %v215_v6 = vpop.eup %214 }
  0x43   :  { %v151_v7 = vsub.f32 %v148_v5, %v215_v6  ;;  %v135_v47 = vadd.f32 %v134_v45, %v127_v44 }
  0x45   :  { %v152_v8 = vmul.f32 -0.5, %v151_v7  ;;  %v136_v48 = vadd.f32 %v135_v47, %v128_v46 }
  0x47   :  { %v154_v9 = vsel %vm153_vm0, %v152_v8, 0.0  ;;  %143 = vst [vmem:[#allocation11] sm:$0xff] %v136_v48 }
  0x48   :  { %155 = vadd.xlane.f32.xlu0 %v154_v9 }
  0x49   :  { %307 = shalt.err (!%p304_p10)
}
  0x4a   :  { %178 = dma.vmem_to_hbm [thread:$0]  %s176_s3, 128, %s406_s4, [#allocation5]  }
  0x4b   :  { %s353_s16 = smov [#allocation12]  }
  0x4c   :  { %s185_s17 = sshll.u32 %s353_s16, 4  ;;  %s186_s17 = int_to_ptr.vmem [resolvable:$true] %s185_s17 }
  0x4d   :  { %s316_s20 = scalar_lea.vmem %s186_s17, 128  ;;  %p321_p12 = scmp.lt.s32.totalorder %s186_s17, %s186_s17 }
  0x4e   :  { %p317_p11 = scmp.ne.s32.totalorder %s186_s17, %s316_s20  ;;  %p322_p13 = scmp.lt.s32.totalorder %s316_s20, %s316_s20 }
  0x50   :  { %p323_p0 = por %p322_p13, %p321_p12 }
  0x52   :  { %p324_p1 = pnand %p323_p0, %p317_p11 }
  0xd1   :  { %v156_v49 = vpop.xlane.xlu0 %155 }
  0xd2   :  { %v157_v50 = vrot.slane %v156_v49, 4 }
  0xd4   :  { %v158_v51 = vadd.f32 %v157_v50, %v156_v49 }
  0xd6   :  { %v159_v52 = vrot.slane %v158_v51, 2 }
  0xd8   :  { %v160_v53 = vadd.f32 %v159_v52, %v158_v51 }
  0xda   :  { %v161_v54 = vrot.slane %v160_v53, 1 }
  0xdc   :  { %v162_v55 = vadd.f32 %v161_v54, %v160_v53 }
  0xde   :  { %204 = vpush %v162_v55 }
 0x10f   :  { %s205_s18 = spop %204 }
 0x110   :  { %s166_s19 = smul.f32 0.125, %s205_s18 }
 0x112   :  { %v167_v56 = vstv %s166_s19 }
 0x113   :  { %168 = vst [vmem:[#allocation12] sm:$0xff] %v167_v56 }
 0x114   :  { %327 = shalt.err (!%p324_p1)
}
 0x115   :  { %188 = dma.vmem_to_hbm [thread:$0]  %s186_s17, 128, %s407_s5, [#allocation13]  }
 0x116   :  { %342 = dma.done.wait [#allocation5], 128  }
 0x117   :  { %343 = vsyncadd [#allocation5], 4294967168 }
 0x118   :  { %344 = dma.done.wait [#allocation13], 128  }
 0x119   :  { %345 = vsyncadd [#allocation13], 4294967168 }
 0x11a   :  { %195 = vsyncpa [#allocation4], 1 }
 0x11b   :  { %196 = vsyncpa [#allocation7], 1 }
 0x11c   :  { %197 = vsyncpa [#allocation10], 1 }
 0x11d   :  { %198 = vsyncpa [#allocation5], 1 }
 0x11e   :  { %199 = vsyncpa [#allocation13], 1 }

</bundles_post_ra>
